<compile_context>
chip_gen: v5e
topology: v5e:2x2
jax: 0.10.0
libtpu: 0.0.40
codegen_flags: <defaults>
</compile_context>

<pallas_src>
import functools

import jax
import jax.numpy as jnp
from jax import lax
from jax.experimental import pallas as pl
from jax.experimental.pallas import tpu as pltpu


def _ceil_to(n, m):
    return ((n + m - 1) // m) * m


def _stable_softplus(x):
    # numerically stable softplus: max(x, 0) + log1p(exp(-|x|))
    return jnp.maximum(x, 0.0) + jnp.log1p(jnp.exp(-jnp.abs(x)))


def _vae_bottleneck_kernel(*refs, latent_size, sampling, has_residual, fused_dot):
    """One batch tile of the VAE bottleneck.

        vec = x @ W.T + b              (MXU, f32 accumulation)
        mu  = vec[:, :L]   (+ optional residual mix)
        var = softplus(vec[:, L:])     (+ optional residual mix)
        z   = mu + noise * var         (noise is a pipelined input tile)
    """
    L = latent_size
    it = iter(refs)
    x_ref = next(it)
    w_ref = next(it)
    b_ref = next(it)
    noise_ref = next(it) if sampling else None
    rq_ref = next(it) if has_residual else None
    out0_ref = next(it)
    vec_ref = next(it)

    x = x_ref[...]
    # Contract the H axis of x (dim 1) with the H axis of W (dim 1): x @ W.T,
    # consumed natively by the MXU with f32 accumulation (no wrapper transpose).
    dn = (((1,), (1,)), ((), ()))

    if fused_dot:
        # L % 128 == 0: one MXU pass over the full resident weight, a single
        # lane-dense vec store, and lane-aligned vreg slices for mu / logvar.
        r = lax.dot_general(x, w_ref[...], dn,
                            preferred_element_type=jnp.float32) + b_ref[...]
        vec_ref[...] = r.astype(vec_ref.dtype)
        mu = r[:, 0:L]
        lv = r[:, L:2 * L]
    else:
        # L % 128 != 0: split the *operand* along sublanes instead of slicing
        # the MXU result at a non-128-aligned lane offset.
        mu = lax.dot_general(x, w_ref[0:L, :], dn,
                             preferred_element_type=jnp.float32) + b_ref[0:1, :]
        lv = lax.dot_general(x, w_ref[L:2 * L, :], dn,
                             preferred_element_type=jnp.float32) + b_ref[1:2, :]
        vec_ref[:, 0:L] = mu.astype(vec_ref.dtype)
        vec_ref[:, L:2 * L] = lv.astype(vec_ref.dtype)

    if has_residual:
        rq = rq_ref[...]
        mu = 0.5 * (mu + rq[:, 0:L])

    if sampling:
        noise = noise_ref[...].astype(jnp.float32)
        var = _stable_softplus(lv)                   # EUP exp + VPU
        if has_residual:
            var = 0.5 * (var + _stable_softplus(rq[:, L:2 * L]))
        out0_ref[...] = (mu + noise * var).astype(out0_ref.dtype)
    else:
        # non-sampling path: no noise / z work at all -- write mu directly.
        out0_ref[...] = mu.astype(out0_ref.dtype)


def vae_bottleneck_forward(x, weight, bias, *, latent_size, sampling=True,
                           residual_q=None, noise=None, rng_key=None,
                           block_b=None, matmul_dtype=None, out_dtype=None):
    """Pallas-backed equivalent of VAEBottleneck.forward.

    x:          [B, H]      float32 (or bf16)
    weight:     [2*L, H]    PyTorch nn.Linear weight layout (NOT transposed)
    bias:       [2*L]
    residual_q: [B, 2*L]    optional
    noise:      [B, L]      optional N(0,1); generated from rng_key if omitted
    Returns (z, vec) when sampling else (mu, vec).
    """
    B, H = x.shape
    L = latent_size
    assert weight.shape == (2 * L, H)
    assert bias.shape == (2 * L,)

    out_dtype = x.dtype if out_dtype is None else out_dtype
    if matmul_dtype is not None and matmul_dtype != x.dtype:
        # bf16 operand traffic is MXU-native on v5e/v6e/v7x; epilogue stays f32.
        x = x.astype(matmul_dtype)
        weight = weight.astype(matmul_dtype)

    fused_dot = (L % 128 == 0)
    has_residual = residual_q is not None

    in_es = jnp.dtype(x.dtype).itemsize
    out_es = jnp.dtype(out_dtype).itemsize
    sub = 16 if in_es < 4 else 8      # sublane packing granularity

    # ---- batch-tile sizing (VMEM-budget aware, resident weight subtracted) --
    if block_b is None:
        resident = 2 * L * H * in_es + 2 * L * 4            # weight + bias
        per_row = 2 * (H * in_es + 3 * L * out_es)           # x, z, vec (x2 bufs)
        if sampling:
            per_row += 2 * L * 4                             # noise tile
        if has_residual:
            per_row += 2 * 2 * L * 4                         # residual tile
        budget = 24 * 1024 * 1024      # fits v5e/v6e scoped VMEM and v7x's 64 MiB
        avail = max(budget - 2 * resident, per_row * sub)
        block_b = max(sub, min(2048, avail // max(per_row, 1)))

    tB = int(min(block_b, B))
    if B > 2 * sub:
        # keep >= 2 grid steps so both v7x TensorCores get work
        tB = min(tB, max(sub, _ceil_to(pl.cdiv(B, 2), sub)))
    if tB < B:
        tB = max(sub, (tB // sub) * sub)   # sublane-aligned partial blocks
    grid = (pl.cdiv(B, tB),)

    # ---- operands / specs ----------------------------------------------------
    if fused_dot:
        b_arr = bias.reshape(1, 2 * L).astype(jnp.float32)
        b_spec = pl.BlockSpec((1, 2 * L), lambda i: (0, 0))
    else:
        b_arr = bias.reshape(2, L).astype(jnp.float32)       # row 0 = mu, row 1 = logvar
        b_spec = pl.BlockSpec((2, L), lambda i: (0, 0))

    in_specs = [
        pl.BlockSpec((tB, H), lambda i: (i, 0)),              # x tile
        pl.BlockSpec((2 * L, H), lambda i: (0, 0)),           # weight (VMEM resident)
        b_spec,                                               # bias (VMEM resident)
    ]
    operands = [x, weight, b_arr]

    if sampling:
        if noise is None:
            key = jax.random.PRNGKey(0) if rng_key is None else rng_key
            noise = jax.random.normal(key, (B, L), dtype=jnp.float32)
        assert noise.shape == (B, L)
        in_specs.append(pl.BlockSpec((tB, L), lambda i: (i, 0)))
        operands.append(noise.astype(jnp.float32))
    if has_residual:
        assert residual_q.shape == (B, 2 * L)
        in_specs.append(pl.BlockSpec((tB, 2 * L), lambda i: (i, 0)))
        operands.append(residual_q.astype(jnp.float32))

    out_specs = [
        pl.BlockSpec((tB, L), lambda i: (i, 0)),              # z (or mu)
        pl.BlockSpec((tB, 2 * L), lambda i: (i, 0)),          # vec
    ]
    out_shape = (
        jax.ShapeDtypeStruct((B, L), out_dtype),
        jax.ShapeDtypeStruct((B, 2 * L), out_dtype),
    )

    # ---- VMEM limit + cost estimate -------------------------------------------
    resident_bytes = 2 * (2 * L * H * in_es + 2 * L * 4)
    tile_bytes = 2 * (tB * H * in_es + 3 * tB * L * out_es
                      + (tB * L * 4 if sampling else 0)
                      + (tB * 2 * L * 4 if has_residual else 0))
    vmem_limit = int(min(64 << 20, max(resident_bytes + tile_bytes + (2 << 20),
                                       16 << 20)))

    flops = 4 * B * H * L                                     # 2 * B * H * (2L)
    transcendentals = (2 * B * L) if sampling else 0
    bytes_accessed = (B * H * in_es + 2 * L * H * in_es + 2 * L * 4
                      + B * L * out_es + B * 2 * L * out_es)
    if sampling:
        bytes_accessed += B * L * 4
    if has_residual:
        bytes_accessed += B * 2 * L * 4

    kernel = functools.partial(_vae_bottleneck_kernel,
                               latent_size=L, sampling=sampling,
                               has_residual=has_residual, fused_dot=fused_dot)

    out0, vec = pl.pallas_call(
        kernel,
        grid=grid,
        in_specs=in_specs,
        out_specs=out_specs,
        out_shape=out_shape,
        compiler_params=pltpu.CompilerParams(
            dimension_semantics=("parallel",),
            vmem_limit_bytes=vmem_limit),
        cost_estimate=pl.CostEstimate(flops=flops,
                                      transcendentals=transcendentals,
                                      bytes_accessed=bytes_accessed),
    )(*operands)

    return out0, vec


if __name__ == "__main__":
    key = jax.random.PRNGKey(0)

    # ---------------- Test 1: small module shapes (L % 128 != 0 path) --------
    B, H, L = 8, 32, 32
    k1, k2, k3, k4 = jax.random.split(key, 4)
    x = jax.random.normal(k1, (B, H), dtype=jnp.float32)
    weight = jax.random.normal(k2, (2 * L, H), dtype=jnp.float32) * 0.1
    bias = jax.random.normal(k3, (2 * L,), dtype=jnp.float32) * 0.01
    noise = jax.random.normal(k4, (B, L), dtype=jnp.float32)

    z, vec = vae_bottleneck_forward(x, weight, bias, latent_size=L,
                                    sampling=True, noise=noise)
    mu_ns, vec_ns = vae_bottleneck_forward(x, weight, bias, latent_size=L,
                                           sampling=False)
    jax.block_until_ready((z, vec, mu_ns, vec_ns))

    vec_ref = x @ weight.T + bias
    mu_ref = vec_ref[:, :L]
    var_ref = jax.nn.softplus(vec_ref[:, L:])
    z_ref = mu_ref + noise * var_ref

    assert jnp.allclose(vec, vec_ref, atol=1e-4, rtol=1e-4)
    assert jnp.allclose(vec_ns, vec_ref, atol=1e-4, rtol=1e-4)
    assert jnp.allclose(mu_ns, mu_ref, atol=1e-4, rtol=1e-4)
    assert jnp.allclose(z, z_ref, atol=1e-4, rtol=1e-4)

    # -------- Test 2: fused-dot path (L % 128 == 0), ragged grid, residual_q --
    B2, H2, L2 = 24, 128, 128
    q1, q2, q3, q4, q5 = jax.random.split(jax.random.PRNGKey(7), 5)
    x2 = jax.random.normal(q1, (B2, H2), dtype=jnp.float32)
    w2 = jax.random.normal(q2, (2 * L2, H2), dtype=jnp.float32) * 0.05
    b2 = jax.random.normal(q3, (2 * L2,), dtype=jnp.float32) * 0.01
    rq = jax.random.normal(q4, (B2, 2 * L2), dtype=jnp.float32)
    n2 = jax.random.normal(q5, (B2, L2), dtype=jnp.float32)

    z2, vec2 = vae_bottleneck_forward(x2, w2, b2, latent_size=L2,
                                      sampling=True, residual_q=rq,
                                      noise=n2, block_b=16)
    mu2_ns, vec2_ns = vae_bottleneck_forward(x2, w2, b2, latent_size=L2,
                                             sampling=False, residual_q=rq,
                                             block_b=16)
    jax.block_until_ready((z2, vec2, mu2_ns, vec2_ns))

    vec2_ref = x2 @ w2.T + b2
    mu2_raw = vec2_ref[:, :L2]
    mu2_ref = 0.5 * (mu2_raw + rq[:, :L2])
    var2_ref = 0.5 * (jax.nn.softplus(vec2_ref[:, L2:]) + jax.nn.softplus(rq[:, L2:]))
    z2_ref = mu2_ref + n2 * var2_ref

    assert jnp.allclose(vec2, vec2_ref, atol=1e-4, rtol=1e-4)
    assert jnp.allclose(vec2_ns, vec2_ref, atol=1e-4, rtol=1e-4)
    assert jnp.allclose(mu2_ns, mu2_ref, atol=1e-4, rtol=1e-4)
    assert jnp.allclose(z2, z2_ref, atol=1e-4, rtol=1e-4)

    print("KERNEL_OK")
</pallas_src>

<mosaic_0001>
module attributes {stable_mosaic.version = 11 : i64} {
  func.func @_vae_bottleneck_kernel(%arg0: i32, %arg1: memref<8x32xf32, #tpu.memory_space<vmem>>, %arg2: memref<64x32xf32, #tpu.memory_space<vmem>>, %arg3: memref<2x32xf32, #tpu.memory_space<vmem>>, %arg4: memref<8x32xf32, #tpu.memory_space<vmem>>, %arg5: memref<8x32xf32, #tpu.memory_space<vmem>>, %arg6: memref<8x64xf32, #tpu.memory_space<vmem>>) attributes {dimension_semantics = [#tpu.dimension_semantics<parallel>], iteration_bounds = array<i64: 1>, scalar_prefetch = 0 : i64, scratch_operands = 0 : i64, tpu.core_type = #tpu.core_type<tc>, window_params = [{transform_indices = @transform_0, window_bounds = array<i64: 8, 32>}, {pipeline_mode = #tpu.pipeline_mode<synchronous>, transform_indices = @transform_1, window_bounds = array<i64: 64, 32>}, {pipeline_mode = #tpu.pipeline_mode<synchronous>, transform_indices = @transform_2, window_bounds = array<i64: 2, 32>}, {transform_indices = @transform_3, window_bounds = array<i64: 8, 32>}, {transform_indices = @transform_4, window_bounds = array<i64: 8, 32>}, {transform_indices = @transform_5, window_bounds = array<i64: 8, 64>}]} {
    %c0 = arith.constant 0 : index
    %c0_0 = arith.constant 0 : index
    %0 = vector.load %arg1[%c0, %c0_0] : memref<8x32xf32, #tpu.memory_space<vmem>>, vector<8x32xf32>
    %c0_1 = arith.constant 0 : index
    %c0_2 = arith.constant 0 : index
    %1 = vector.load %arg2[%c0_1, %c0_2] : memref<64x32xf32, #tpu.memory_space<vmem>>, vector<32x32xf32>
    %cst = arith.constant dense<0.000000e+00> : vector<8x32xf32>
    %2 = tpu.matmul %0, %1, %cst {dimension_numbers = #tpu.dot_dimension_numbers<[1], [1], [0], [0], [0, 0, 1, 0], [], []>} : vector<8x32xf32>, vector<32x32xf32>, vector<8x32xf32> -> vector<8x32xf32>
    %c0_3 = arith.constant 0 : index
    %c0_4 = arith.constant 0 : index
    %3 = vector.load %arg3[%c0_3, %c0_4] : memref<2x32xf32, #tpu.memory_space<vmem>>, vector<1x32xf32>
    %4 = vector.broadcast %3 : vector<1x32xf32> to vector<8x32xf32>
    %5 = arith.addf %2, %4 : vector<8x32xf32>
    %c32 = arith.constant 32 : index
    %c0_5 = arith.constant 0 : index
    %6 = vector.load %arg2[%c32, %c0_5] : memref<64x32xf32, #tpu.memory_space<vmem>>, vector<32x32xf32>
    %cst_6 = arith.constant dense<0.000000e+00> : vector<8x32xf32>
    %7 = tpu.matmul %0, %6, %cst_6 {dimension_numbers = #tpu.dot_dimension_numbers<[1], [1], [0], [0], [0, 0, 1, 0], [], []>} : vector<8x32xf32>, vector<32x32xf32>, vector<8x32xf32> -> vector<8x32xf32>
    %c1 = arith.constant 1 : index
    %c0_7 = arith.constant 0 : index
    %8 = vector.load %arg3[%c1, %c0_7] : memref<2x32xf32, #tpu.memory_space<vmem>>, vector<1x32xf32>
    %9 = vector.broadcast %8 : vector<1x32xf32> to vector<8x32xf32>
    %10 = arith.addf %7, %9 : vector<8x32xf32>
    %c0_8 = arith.constant 0 : index
    %c0_9 = arith.constant 0 : index
    %11 = vector.load %arg6[%c0_8, %c0_9] : memref<8x64xf32, #tpu.memory_space<vmem>>, vector<8x32xf32>
    tpu.vector_store %arg6[%c0_8, %c0_9], %5 {strides = array<i32>} : memref<8x64xf32, #tpu.memory_space<vmem>>, vector<8x32xf32>,
    %c0_10 = arith.constant 0 : index
    %c32_11 = arith.constant 32 : index
    %12 = vector.load %arg6[%c0_10, %c32_11] : memref<8x64xf32, #tpu.memory_space<vmem>>, vector<8x32xf32>
    tpu.vector_store %arg6[%c0_10, %c32_11], %10 {strides = array<i32>} : memref<8x64xf32, #tpu.memory_space<vmem>>, vector<8x32xf32>,
    %c0_12 = arith.constant 0 : index
    %c0_13 = arith.constant 0 : index
    %13 = vector.load %arg4[%c0_12, %c0_13] : memref<8x32xf32, #tpu.memory_space<vmem>>, vector<8x32xf32>
    %cst_14 = arith.constant 0.000000e+00 : f32
    %14 = vector.broadcast %cst_14 : f32 to vector<8x32xf32>
    %15 = arith.maximumf %10, %14 : vector<8x32xf32>
    %16 = math.absf %10 : vector<8x32xf32>
    %cst_15 = arith.constant 0.000000e+00 : f32
    %17 = vector.broadcast %cst_15 : f32 to vector<8x32xf32>
    %18 = arith.subf %17, %16 : vector<8x32xf32>
    %19 = math.exp %18 : vector<8x32xf32>
    %20 = math.log1p %19 : vector<8x32xf32>
    %21 = arith.addf %15, %20 : vector<8x32xf32>
    %22 = arith.mulf %13, %21 : vector<8x32xf32>
    %23 = arith.addf %5, %22 : vector<8x32xf32>
    %c0_16 = arith.constant 0 : index
    %c0_17 = arith.constant 0 : index
    %24 = vector.load %arg5[%c0_16, %c0_17] : memref<8x32xf32, #tpu.memory_space<vmem>>, vector<8x32xf32>
    tpu.vector_store %arg5[%c0_16, %c0_17], %23 {strides = array<i32>} : memref<8x32xf32, #tpu.memory_space<vmem>>, vector<8x32xf32>,
    return
  }
  func.func @transform_0(%arg0: i32) -> (i32, i32) {
    %c0_i32 = arith.constant 0 : i32
    %c0_i32_0 = arith.constant 0 : i32
    return %arg0, %c0_i32 : i32, i32
  }
  func.func @transform_1(%arg0: i32) -> (i32, i32) {
    %c0_i32 = arith.constant 0 : i32
    %c0_i32_0 = arith.constant 0 : i32
    %c0_i32_1 = arith.constant 0 : i32
    return %c0_i32, %c0_i32_0 : i32, i32
  }
  func.func @transform_2(%arg0: i32) -> (i32, i32) {
    %c0_i32 = arith.constant 0 : i32
    %c0_i32_0 = arith.constant 0 : i32
    %c0_i32_1 = arith.constant 0 : i32
    return %c0_i32, %c0_i32_0 : i32, i32
  }
  func.func @transform_3(%arg0: i32) -> (i32, i32) {
    %c0_i32 = arith.constant 0 : i32
    %c0_i32_0 = arith.constant 0 : i32
    return %arg0, %c0_i32 : i32, i32
  }
  func.func @transform_4(%arg0: i32) -> (i32, i32) {
    %c0_i32 = arith.constant 0 : i32
    %c0_i32_0 = arith.constant 0 : i32
    return %arg0, %c0_i32 : i32, i32
  }
  func.func @transform_5(%arg0: i32) -> (i32, i32) {
    %c0_i32 = arith.constant 0 : i32
    %c0_i32_0 = arith.constant 0 : i32
    return %arg0, %c0_i32 : i32, i32
  }
}

</mosaic_0001>

<bundles_post_ra>
// kernel: tpu_custom_call.1
= control target key start
LH: loop header
LB: loop body
LE: loop exit
PB: predicated region body
PF: predicated region fallthrough
CT: control target
= control target key end

     0   :  { %11 = vsyncpa [#allocation3], 0  ;;  %vm28_vm0 = vcmask 261120   ;;  %s318_s0 = inlined_call_operand.vmem [shape: f32[8,32], index: 0, kind: input, shape index: {}]   ;;  %s319_s1 = inlined_call_operand.vmem [shape: f32[64,32], index: 1, kind: input, shape index: {}]   ;;  %s320_s2 = inlined_call_operand.vmem [shape: f32[2,32], index: 2, kind: input, shape index: {}]   ;;  %s321_s3 = inlined_call_operand.vmem [shape: f32[8,32], index: 3, kind: input, shape index: {}]   ;;  %s322_s4 = inlined_call_operand.hbm [shape: f32[8,32], index: 4, kind: output, shape index: {0}]   ;;  %s323_s5 = inlined_call_operand.hbm [shape: f32[8,64], index: 5, kind: output, shape index: {1}]  }
   0x1   :  { %v67_v0 = vld [vmem:[%s319_s1 + $0x38] sm:$0xff]  ;;  %v66_v2 = vld [vmem:[%s319_s1 + $0x30] sm:$0xff] }
   0x2   :  { %165 = vmatpush.xpose.msk.msra.mxu1 %vm28_vm0, %v67_v0  ;;  %v25_v1 = vld [vmem:[%s319_s1 + $0x18] sm:$0xff]  ;;  %v24_v3 = vld [vmem:[%s319_s1 + $0x10] sm:$0xff] }
   0x3   :  { %160 = vmatpush.xpose.msk.msra.mxu0 %vm28_vm0, %v25_v1 }
   0x4   :  { %12 = vsyncpa [#allocation5], 0  ;;  %v65_v4 = vld [vmem:[%s319_s1 + $0x28] sm:$0xff]  ;;  %v64_v6 = vld [vmem:[%s319_s1 + $0x20] sm:$0xff]  ;;  %s232_s15 = smov [#allocation2]   ;;  %s135_s19 = sshll.u32 %s322_s4, 4  ;;  %s136_s19 = int_to_ptr.hbm [resolvable:$true] %s135_s19 }
   0x5   :  { %v23_v5 = vld [vmem:[%s319_s1 + $0x8] sm:$0xff]  ;;  %v22_v7 = vld [vmem:[%s319_s1] sm:$0xff]  ;;  %s133_s16 = sshll.u32 %s232_s15, 4  ;;  %s233_s20 = smov [#allocation4]   ;;  %vm107_vm2 = vcmask 523520   ;;  %s134_s16 = int_to_ptr.vmem [resolvable:$true] %s133_s16 }
   0x6   :  { %166 = vmatpush.xpose.msk.msra.mxu1 %vm28_vm0, %v66_v2  ;;  %v21_v8 = vld [vmem:[%s318_s0] sm:$0xff]  ;;  %s231_s0 = smov 32   ;;  %s144_s21 = sshll.u32 %s233_s20, 4  ;;  %s145_s21 = int_to_ptr.vmem [resolvable:$true] %s144_s21 }
   0x7   :  { %161 = vmatpush.xpose.msk.msra.mxu0 %vm28_vm0, %v24_v3  ;;  %v173_v9 = vld [vmem:[%s320_s2 + $0x1] ss:$0 sm:$0xff]  ;;  %v174_v10 = vld [vmem:[%s320_s2] ss:$0 sm:$0xff] }
   0x8   :  { %v109_v27 = vld [vmem:[%s321_s3] sm:$0xff]  ;;  %s146_s3 = sshll.u32 %s323_s5, 4  ;;  %s147_s3 = int_to_ptr.hbm [resolvable:$true] %s146_s3 }
   0xa   :  { %167 = vmatpush.xpose.msk.msra.mxu1 %vm28_vm0, %v65_v4 }
   0xb   :  { %162 = vmatpush.xpose.msk.msra.mxu0 %vm28_vm0, %v23_v5 }
   0xe   :  { %168 = vmatpush.xpose.msk.msra.mxu1 %vm28_vm0, %v64_v6 }
   0xf   :  { %163 = vmatpush.xpose.msk.msra.mxu0 %vm28_vm0, %v22_v7 }
  0x11   :  { %169 = vmatmul.msk.f32.vlgmr.msra.gmra.mxu1 %vm28_vm0, %v21_v8 }
  0x12   :  { %164 = vmatmul.msk.f32.vlgmr.msra.gmra.mxu0 %vm28_vm0, %v21_v8 }
  0x8e   :  { %v99_v11 = vpop.f32.mrf.mxu1 }
  0x8f   :  { %v100_v12 = vadd.f32 %v173_v9, %v99_v11  ;;  %v61_v13 = vpop.f32.mrf.mxu0 }
  0x90   :  { %v62_v14 = vadd.f32 %v174_v10, %v61_v13 }
  0x91   :  { %v111_v15 = vand.u32 2147483647, %v100_v12  ;;  %104 = vrot.lane.b32.xlu0 %v100_v12, %s231_s0  ;;  %v110_v26 = vmax.f32 %v100_v12, 0.0 }
  0x92   :  { %102 = vst.msk [vmem:[#allocation4] sm:$0xff] %vm28_vm0, %v62_v14 }
  0x93   :  { %v112_v16 = vsub.f32 0.0, %v111_v15 }
  0x95   :  { %v113_v17 = vmul.f32 1.442695, %v112_v16 }
  0x97   :  { %175 = vpow2.f32 %v113_v17 }
  0x9d   :  { %v176_v18 = vpop.eup %175 }
  0x9e   :  { %v115_v19 = vadd.f32 1.0, %v176_v18  ;;  %v118_v20 = vmul.f32 -0.5, %v176_v18  ;;  %v121_v22 = vand.u32 2147483647, %v176_v18 }
  0xa0   :  { %177 = vlog2.f32 %v115_v19  ;;  %v119_v21 = vadd.f32 1.0, %v118_v20  ;;  %vm122_vm1 = vcmp.lt.f32.partialorder %v121_v22, 0.0004427343 }
  0xa2   :  { %v120_v25 = vmul.f32 %v176_v18, %v119_v21 }
  0xa6   :  { %v178_v23 = vpop.eup %177 }
  0xa7   :  { %v117_v24 = vmul.f32 0.6931472, %v178_v23 }
  0xa9   :  { %v123_v28 = vsel %vm122_vm1, %v120_v25, %v117_v24 }
  0xaa   :  { %v124_v29 = vadd.f32 %v123_v28, %v110_v26 }
  0xac   :  { %v125_v30 = vmul.f32 %v124_v29, %v109_v27 }
  0xae   :  { %v126_v31 = vadd.f32 %v125_v30, %v62_v14 }
  0xb0   :  { %127 = vst.msk [vmem:[#allocation2] sm:$0xff] %vm28_vm0, %v126_v31 }
  0xb1   :  { %138 = dma.vmem_to_hbm [thread:$0]  %s134_s16, 128, %s136_s19, [#allocation3]  }
 0x103   :  { %v105_v32 = vpop.permute.xlu0 %104 }
 0x104   :  { %108 = vst.msk [vmem:[#allocation4] sm:$0xff] %vm107_vm2, %v105_v32 }
 0x105   :  { %149 = dma.vmem_to_hbm [thread:$0]  %s145_s21, 128, %s147_s3, [#allocation5]  }
 0x106   :  { %227 = dma.done.wait [#allocation3], 128  }
 0x107   :  { %228 = vsyncadd [#allocation3], 4294967168 }
 0x108   :  { %229 = dma.done.wait [#allocation5], 128  }
 0x109   :  { %230 = vsyncadd [#allocation5], 4294967168 }
 0x10a   :  { %158 = vsyncpa [#allocation3], 1 }
 0x10b   :  { %159 = vsyncpa [#allocation5], 1 }

</bundles_post_ra>
